<compile_context>
chip_gen: v6e
topology: v6e:2x2x1
jax: 0.10.0
libtpu: 0.0.40
codegen_flags: <defaults>
</compile_context>

<pallas_src>
import functools
import math

import jax
import jax.numpy as jnp
from jax.experimental import pallas as pl
from jax.experimental.pallas import tpu as pltpu


def _vmem_capacity_bytes() -> int:
    """Physical VMEM per core (generation-aware); conservative fallback."""
    try:
        return int(pltpu.get_tpu_info().vmem_capacity_bytes)
    except Exception:
        return 64 << 20          # v7x per-TensorCore size (smallest current part)


# --------------------------------------------------------------------------
# Pass 1: one-shot row L2-normalization (f32 in -> bf16 normalized out).
# Used for both the class-weight matrix and the input activations.
# --------------------------------------------------------------------------
def _rownorm_kernel(x_ref, out_ref):
    x = x_ref[...].astype(jnp.float32)
    # F.normalize eps=1e-12 on the norm == 1e-24 clamp on the squared norm.
    inv = jax.lax.rsqrt(jnp.maximum(jnp.sum(x * x, axis=-1, keepdims=True), 1e-24))
    out_ref[...] = (x * inv).astype(out_ref.dtype)


def _row_normalize(arr, out_dtype, row_tile, vmem_cap):
    rows, d = arr.shape
    t = rows if rows <= row_tile else max(8, (row_tile // 8) * 8)
    budget = 2 * (t * d * 4 + t * d * jnp.dtype(out_dtype).itemsize) + (2 << 20)
    limit = int(min(max(budget, 8 << 20), int(vmem_cap * 0.75)))
    return pl.pallas_call(
        _rownorm_kernel,
        out_shape=jax.ShapeDtypeStruct((rows, d), out_dtype),
        grid_spec=pltpu.PrefetchScalarGridSpec(
            num_scalar_prefetch=0,
            grid=(pl.cdiv(rows, t),),
            in_specs=[pl.BlockSpec((t, d), lambda r: (r, 0))],
            out_specs=pl.BlockSpec((t, d), lambda r: (r, 0))),
        compiler_params=pltpu.CompilerParams(
            dimension_semantics=("parallel",),
            vmem_limit_bytes=limit),
    )(arr)


# --------------------------------------------------------------------------
# Pass 2: normalized-x @ normalized-w^T on the MXU + per-row ArcFace margin.
# --------------------------------------------------------------------------
def _xface_kernel(label_ref, xn_ref, wn_ref, out_ref, *, s, m, is_train, tile_c):
    """label_ref: [TILE_B, 1] int32; xn_ref: [TILE_B, D] bf16 (pre-normalized);
    wn_ref: [TILE_C, D] bf16 (pre-normalized); out_ref: [TILE_B, TILE_C] f32.
    Grid = (class_tiles, batch_tiles) -> global class offset from program_id(0)."""
    # cosine = xn @ wn.T without materializing a transpose (contract last dims).
    cosine = jax.lax.dot_general(
        xn_ref[...], wn_ref[...],
        dimension_numbers=(((1,), (1,)), ((), ())),
        preferred_element_type=jnp.float32)

    if is_train:
        cos_m = math.cos(m)
        sin_m = math.sin(m)
        th = math.cos(math.pi - m)
        mm = math.sin(math.pi - m) * m

        labels = label_ref[...]                                        # [TILE_B, 1]
        cls = (jax.lax.broadcasted_iota(jnp.int32, cosine.shape, 1)
               + pl.program_id(0) * tile_c)                            # global class ids
        mask = cls == labels                                           # [TILE_B, TILE_C]

        # Per-row margin: extract the single target cosine per row with a masked
        # lane reduction (XLU) and run the ArcFace math on [TILE_B, 1] only.
        target = jnp.sum(jnp.where(mask, cosine, 0.0), axis=-1, keepdims=True)
        sine = jnp.sqrt(jnp.clip(1.0 - target * target, 0.0, 1.0))
        phi = target * cos_m - sine * sin_m
        phi = jnp.where(target > th, phi, target - mm)   # hard-margin fallback
        out = jnp.where(mask, phi, cosine) * s
    else:
        out = cosine * s            # is_train=False -> no penalty

    out_ref[...] = out.astype(out_ref.dtype)


def _vmem_limit_bytes(tile_b, tile_c, d, vmem_cap):
    per_step = 2 * (tile_b * d * 2              # xn tile (bf16), double-buffered
                    + tile_b * 128 * 4          # label tile (lane-padded int32)
                    + tile_c * d * 2            # wn tile (bf16)
                    + tile_b * tile_c * 4)      # out tile (f32)
    scratch = 5 * tile_b * tile_c * 4           # cosine / mask / iota / select temps
    budget = per_step + scratch + (4 << 20)
    ceiling = int(vmem_cap * 0.75)              # headroom under physical VMEM
    return int(min(max(budget, 16 << 20), ceiling))


def xface_forward(x, weight, label, *, s=30.0, m=0.50, is_train=True,
                  tile_b=None, tile_c=None, compute_dtype=jnp.bfloat16):
    """x: [B, D] f32, weight: [C, D] f32, label: [B] int.  Returns [B, C] f32."""
    B, D = x.shape
    C, Dw = weight.shape
    assert D == Dw

    cap = _vmem_capacity_bytes()
    big_vmem = cap >= (96 << 20)                 # v5e/v6e (128 MiB) vs v7x (64 MiB)
    if tile_b is None:
        tile_b = 512 if big_vmem else 256        # multiple of 256 feeds the wide MXU
    if tile_c is None:
        tile_c = 2048 if big_vmem else 1024      # lane-dense, amortizes per-step cost

    TILE_B = B if B <= tile_b else max(8, (tile_b // 8) * 8)
    TILE_C = C if C <= tile_c else max(128, (tile_c // 128) * 128)
    nb = pl.cdiv(B, TILE_B)
    nc = pl.cdiv(C, TILE_C)

    # ---- Pass 1: pre-normalize weight rows and x rows once (bf16 outputs). ----
    wn = _row_normalize(weight, compute_dtype, 1024, cap)
    xn = _row_normalize(x, compute_dtype, 1024, cap)
    lbl = label.astype(jnp.int32).reshape(B, 1)

    # ---- Pass 2: tiled cosine + per-row ArcFace margin. ----
    # Class tiles on the OUTER axis => the (usually huge) weight tile is fetched
    # once per class tile and stays VMEM-resident while the smaller x/label
    # tiles restream across the inner batch axis.
    kernel = functools.partial(_xface_kernel, s=s, m=m, is_train=is_train,
                               tile_c=TILE_C)
    out = pl.pallas_call(
        kernel,
        out_shape=jax.ShapeDtypeStruct((B, C), jnp.float32),
        grid_spec=pltpu.PrefetchScalarGridSpec(
            num_scalar_prefetch=0,
            grid=(nc, nb),
            in_specs=[
                pl.BlockSpec((TILE_B, 1), lambda j, i: (i, 0)),     # labels (int32)
                pl.BlockSpec((TILE_B, D), lambda j, i: (i, 0)),     # normalized x (bf16)
                pl.BlockSpec((TILE_C, D), lambda j, i: (j, 0)),     # normalized W (bf16)
            ],
            out_specs=pl.BlockSpec((TILE_B, TILE_C), lambda j, i: (i, j))),
        compiler_params=pltpu.CompilerParams(
            dimension_semantics=("parallel", "parallel"),
            vmem_limit_bytes=_vmem_limit_bytes(TILE_B, TILE_C, D, cap)),
    )(lbl, xn, wn)

    # NOTE: if the downstream consumer is softmax-CE, fusing the loss here
    # (class axis "arbitrary" + online log-sum-exp accumulator) would remove the
    # [B, C] f32 writeback, which is the dominant remaining HBM traffic.
    return out


# --------------------------------------------------------------------------
# Pure-JAX reference (mirrors the kernel's bf16 MXU operands / f32 accumulate).
# --------------------------------------------------------------------------
def _reference(x, weight, label, *, s=30.0, m=0.50, is_train=True):
    xn = x * jax.lax.rsqrt(jnp.maximum(jnp.sum(x * x, -1, keepdims=True), 1e-24))
    wn = weight * jax.lax.rsqrt(jnp.maximum(jnp.sum(weight * weight, -1, keepdims=True), 1e-24))
    cosine = jax.lax.dot_general(
        xn.astype(jnp.bfloat16), wn.astype(jnp.bfloat16),
        dimension_numbers=(((1,), (1,)), ((), ())),
        preferred_element_type=jnp.float32)
    if not is_train:
        return cosine * s
    sine = jnp.sqrt(jnp.clip(1.0 - cosine * cosine, 0.0, 1.0))
    phi = cosine * math.cos(m) - sine * math.sin(m)
    phi = jnp.where(cosine > math.cos(math.pi - m), phi,
                    cosine - math.sin(math.pi - m) * m)
    one_hot = jax.nn.one_hot(label, weight.shape[0], dtype=jnp.float32)
    return (one_hot * phi + (1.0 - one_hot) * cosine) * s


if __name__ == "__main__":
    # Small shapes consistent with the module: XFace(product, out_dim, last_p_dim)
    B, last_p_dim, out_dim = 8, 32, 16

    key = jax.random.PRNGKey(0)
    kx, kw, kl = jax.random.split(key, 3)
    x = jax.random.normal(kx, (B, last_p_dim), dtype=jnp.float32)
    weight = jax.random.normal(kw, (out_dim, last_p_dim), dtype=jnp.float32) * 0.1
    label = jax.random.randint(kl, (B,), 0, out_dim, dtype=jnp.int32)

    out = jax.block_until_ready(
        xface_forward(x, weight, label, s=30.0, m=0.50, is_train=True))
    ref = _reference(x, weight, label, s=30.0, m=0.50, is_train=True)
    assert out.shape == (B, out_dim)
    assert jnp.allclose(out, ref, atol=1e-2, rtol=1e-3), "train-path mismatch vs reference"

    # eval path (no penalty)
    out_eval = jax.block_until_ready(
        xface_forward(x, weight, label, s=30.0, m=0.50, is_train=False))
    ref_eval = _reference(x, weight, label, is_train=False)
    assert jnp.allclose(out_eval, ref_eval, atol=1e-2, rtol=1e-3), "eval-path mismatch"

    print("KERNEL_OK")
</pallas_src>

<mosaic_0001>
module attributes {stable_mosaic.version = 11 : i64} {
  func.func @_rownorm_kernel(%arg0: i32, %arg1: memref<16x32xf32, #tpu.memory_space<vmem>>, %arg2: memref<16x32xbf16, #tpu.memory_space<vmem>>) attributes {dimension_semantics = [#tpu.dimension_semantics<parallel>], iteration_bounds = array<i64: 1>, scalar_prefetch = 0 : i64, scratch_operands = 0 : i64, tpu.core_type = #tpu.core_type<tc>, window_params = [{transform_indices = @transform_0, window_bounds = array<i64: 16, 32>}, {transform_indices = @transform_1, window_bounds = array<i64: 16, 32>}]} {
    %c0 = arith.constant 0 : index
    %c0_0 = arith.constant 0 : index
    %0 = vector.load %arg1[%c0, %c0_0] : memref<16x32xf32, #tpu.memory_space<vmem>>, vector<16x32xf32>
    %1 = arith.mulf %0, %0 : vector<16x32xf32>
    %cst = arith.constant dense<0.000000e+00> : vector<16xf32>
    %2 = vector.multi_reduction <add>, %1, %cst [1] : vector<16x32xf32> to vector<16xf32>
    %3 = vector.shape_cast %2 : vector<16xf32> to vector<16x1xf32>
    %cst_1 = arith.constant 1.000000e-24 : f32
    %4 = vector.broadcast %cst_1 : f32 to vector<16x1xf32>
    %5 = arith.maximumf %3, %4 : vector<16x1xf32>
    %6 = math.rsqrt %5 : vector<16x1xf32>
    %7 = vector.broadcast %6 : vector<16x1xf32> to vector<16x32xf32>
    %8 = arith.mulf %0, %7 : vector<16x32xf32>
    %9 = arith.truncf %8 : vector<16x32xf32> to vector<16x32xbf16>
    %c0_2 = arith.constant 0 : index
    %c0_3 = arith.constant 0 : index
    %10 = vector.load %arg2[%c0_2, %c0_3] : memref<16x32xbf16, #tpu.memory_space<vmem>>, vector<16x32xbf16>
    tpu.vector_store %arg2[%c0_2, %c0_3], %9 {strides = array<i32>} : memref<16x32xbf16, #tpu.memory_space<vmem>>, vector<16x32xbf16>,
    return
  }
  func.func @transform_0(%arg0: i32) -> (i32, i32) {
    %c0_i32 = arith.constant 0 : i32
    %c0_i32_0 = arith.constant 0 : i32
    return %arg0, %c0_i32 : i32, i32
  }
  func.func @transform_1(%arg0: i32) -> (i32, i32) {
    %c0_i32 = arith.constant 0 : i32
    %c0_i32_0 = arith.constant 0 : i32
    return %arg0, %c0_i32 : i32, i32
  }
}

</mosaic_0001>

<bundles_post_ra>
// kernel: tpu_custom_call.1
= control target key start
LH: loop header
LB: loop body
LE: loop exit
PB: predicated region body
PF: predicated region fallthrough
CT: control target
= control target key end

     0   :  { %6 = vsyncpa [#allocation3], 0  ;;  %s148_s0 = inlined_call_operand.hbm [shape: f32[16,32], index: 0, kind: input, shape index: {}]   ;;  %s149_s1 = inlined_call_operand.hbm [shape: bf16[16,32], index: 1, kind: output, shape index: {}]  }
   0x1   :  { %7 = vsyncpa [#allocation4], 0  ;;  %s126_s6 = smov [#allocation2]  }
   0x2   :  { %s13_s7 = sshll.u32 %s126_s6, 4  ;;  %s14_s7 = int_to_ptr.vmem [resolvable:$true] %s13_s7 }
   0x3   :  { %s90_s8 = scalar_lea.vmem %s14_s7, 256  ;;  %p95_p1 = scmp.lt.s32.totalorder %s14_s7, %s14_s7 }
   0x4   :  { %p91_p0 = scmp.ne.s32.totalorder %s14_s7, %s90_s8  ;;  %p96_p2 = scmp.lt.s32.totalorder %s90_s8, %s90_s8 }
   0x6   :  { %p97_p3 = por %p96_p2, %p95_p1 }
   0x8   :  { %p98_p4 = pnand %p97_p3, %p91_p0 }
   0xa   :  { %101 = shalt.err (!%p98_p4)
}
   0xb   :  { %s127_s9 = smov 128   ;;  %s128_s10 = smov 8  }
   0xc   :  { %19 = dma.hbm_to_vmem [thread:$0]  %s148_s0, 256, %s14_s7, [#allocation3], %s127_s9, %s127_s9, %s128_s10  }
   0xd   :  { %122 = dma.done.wait [#allocation3], 256  }
   0xe   :  { %123 = vsyncadd [#allocation3], 4294967040  ;;  %v23_v0 = vld [vmem:[#allocation2] sm:$0xff]  ;;  %vm27_vm0 = vcmask 261120   ;;  %v24_v1 = vld [vmem:[#allocation2 + $0x8] sm:$0xff]  ;;  %vm48_vm1 = vcmask 257024  }
   0xf   :  { %v25_v2 = vmul.f32 %v23_v0, %v23_v0  ;;  %v26_v3 = vmul.f32 %v24_v1, %v24_v1  ;;  %s129_s0 = smov [#allocation5]  }
  0x10   :  { %s56_s13 = sshll.u32 %s129_s0, 4  ;;  %s57_s13 = int_to_ptr.vmem [resolvable:$true] %s56_s13 }
  0x11   :  { %v28_v4 = vsel %vm27_vm0, %v25_v2, 0.0  ;;  %v31_v5 = vsel %vm27_vm0, %v26_v3, 0.0  ;;  %s102_s14 = scalar_lea.vmem %s57_s13, 128  ;;  %p107_p6 = scmp.lt.s32.totalorder %s57_s13, %s57_s13 }
  0x12   :  { %29 = vadd.xlane.f32.xlu0 %v28_v4  ;;  %p103_p5 = scmp.ne.s32.totalorder %s57_s13, %s102_s14  ;;  %p108_p7 = scmp.lt.s32.totalorder %s102_s14, %s102_s14 }
  0x14   :  { %p109_p8 = por %p108_p7, %p107_p6 }
  0x16   :  { %32 = vadd.xlane.f32.xlu0 %v31_v5  ;;  %p110_p9 = pnand %p109_p8, %p103_p5 }
  0x9b   :  { %v30_v6 = vpop.xlane.xlu0 %29 }
  0x9c   :  { %v34_v7 = vmax.f32 %v30_v6, 1e-24 }
  0x9e   :  { %78 = vrsqrt.f32 %v34_v7 }
  0x9f   :  { %v33_v8 = vpop.xlane.xlu0 %32 }
  0xa0   :  { %v35_v9 = vmax.f32 %v33_v8, 1e-24 }
  0xa2   :  { %80 = vrsqrt.f32 %v35_v9 }
  0xab   :  { %v79_v10 = vpop.eup %78 }
  0xac   :  { %v38_v11 = vmul.f32 %v79_v10, %v23_v0 }
  0xae   :  { %v70_v12 = vpack.c.bf16 %v38_v11, %v38_v11 }
  0xaf   :  { %v81_v13 = vpop.eup %80 }
  0xb0   :  { %v39_v14 = vmul.f32 %v81_v13, %v24_v1  ;;  %49 = vst.msk [vmem:[#allocation5] sm:$0xf] %vm48_vm1, %v70_v12 }
  0xb2   :  { %v71_v15 = vpack.c.bf16 %v39_v14, %v39_v14 }
  0xb4   :  { %50 = vst.msk [vmem:[#allocation5 + $0x4] sm:$0xf] %vm48_vm1, %v71_v15 }
  0xb5   :  { %113 = shalt.err (!%p110_p9)
}
  0xb6   :  { %s130_s15 = smov 64   ;;  %s131_s16 = smov 4  }
  0xb7   :  { %62 = dma.vmem_to_hbm [thread:$0]  %s57_s13, 128, %s149_s1, [#allocation4], %s130_s15, %s130_s15, %s131_s16  }
  0xb8   :  { %124 = dma.done.wait [#allocation4], 128  }
  0xb9   :  { %125 = vsyncadd [#allocation4], 4294967168 }
  0xba   :  { %66 = vsyncpa [#allocation3], 1 }
  0xbb   :  { %67 = vsyncpa [#allocation4], 1 }

</bundles_post_ra>
